<compile_context>
chip_gen: v7x
topology: tpu7x:2x2x1
jax: 0.10.0
libtpu: 0.0.40
codegen_flags: <defaults>
</compile_context>

<pallas_src>
import functools

import jax
import jax.numpy as jnp
import numpy as np
from jax.experimental import pallas as pl
from jax.experimental.pallas import tpu as pltpu

LANE = 128        # vreg lane width; batch lives on this axis inside the kernel
FEAT_PAD = 16     # all feature widths (2 / 10 / 1) padded to one sublane tile
RES_SIZES = ((2, 10), (10, 10), (10, 1))   # NETG: Res(2,10) -> Res(10,10) -> Res(10,1)


def _round_up(n, m):
    return ((n + m - 1) // m) * m


def _relu2(y):
    y = jnp.maximum(y, 0.0)
    return y * y


def netg_kernel(x_ref, w_ref, b_ref, o_ref, h_ref, *, res_sizes):
    """Fused NETG forward, batch-on-lanes layout.

    Per grid step:
      x_ref : (d_in, tb)  f32     natural-width input slab (batch on lanes)
      w_ref : (2*n_res, FP, FP)   W^T per linear, zero-padded, MXU dtype
      b_ref : (2*n_res, FP, 1)    bias columns, zero-padded, f32
      o_ref : (n_out, tb) f32     natural-width output slab
      h_ref : (FP, tb)    f32     scratch used only to zero-pad features in VMEM

    Invariant: after block r, feature rows >= n_out_r of `h` are exactly zero
    (padded weight/bias rows are zero and relu(0)^2 == 0), so the skip
    x @ eye(n_in, n_out) is `h` itself (n_in <= n_out) or `h` with rows >= n_out
    masked (n_in > n_out) -- no eye matmul, no eye operand.
    """
    d_in = x_ref.shape[0]
    md = w_ref.dtype                                   # MXU input dtype

    # Zero-pad input features from d_in to FEAT_PAD sublanes, in VMEM only.
    h_ref[...] = jnp.zeros_like(h_ref)
    h_ref[0:d_in, :] = x_ref[...]
    h = h_ref[...]                                     # (FP, tb) f32

    for r, (n_in, n_out) in enumerate(res_sizes):
        if n_in <= n_out:
            skip = h                                   # rows >= n_in already zero
        else:
            row = jax.lax.broadcasted_iota(jnp.int32, h.shape, 0)
            skip = jnp.where(row < n_out, h, 0.0)      # keep first n_out rows

        wa, ba = w_ref[2 * r], b_ref[2 * r]
        wb, bb = w_ref[2 * r + 1], b_ref[2 * r + 1]

        # y^T = W^T @ x^T : (FP,FP) @ (FP,tb) on the MXU, f32 accumulate,
        # bias / relu^2 / skip add in f32 (safe on v5e's f32-only VPU).
        t = jnp.dot(wa, h.astype(md), preferred_element_type=jnp.float32) + ba
        t = _relu2(t)
        t = jnp.dot(wb, t.astype(md), preferred_element_type=jnp.float32) + bb
        t = _relu2(t)
        h = t + skip

    n_final = res_sizes[-1][1]
    o_ref[...] = h[:n_final, :].astype(o_ref.dtype)


def pack_netg_params(params, res_sizes=RES_SIZES, matmul_dtype=jnp.bfloat16):
    """One-time packing (call at init, not per forward).

    params: flat list of 2*n_res (w, b) pairs, w in (fan_in, fan_out) layout
    (i.e. y = x @ w + b).  Returns:
      w_packed: (2*n_res, FP, FP)  W^T zero-padded, cast to the MXU dtype
      b_packed: (2*n_res, FP, 1)   bias columns zero-padded, f32
    """
    ws, bs = [], []
    for (w, b) in params:
        n_in, n_out = w.shape
        wt = jnp.zeros((FEAT_PAD, FEAT_PAD), matmul_dtype)
        wt = wt.at[:n_out, :n_in].set(w.T.astype(matmul_dtype))
        bt = jnp.zeros((FEAT_PAD, 1), jnp.float32)
        bt = bt.at[:n_out, 0].set(b.astype(jnp.float32))
        ws.append(wt)
        bs.append(bt)
    return jnp.stack(ws), jnp.stack(bs)


def netg_forward(x, w_packed, b_packed, res_sizes=RES_SIZES, *, block_batch=2048):
    """x: (batch, d_in) f32 -> (batch, n_out) f32."""
    batch, d_in = x.shape
    n_out = res_sizes[-1][1]

    # Batch on the lane axis.  The only wrapper-side passes are over the
    # natural-width data (d_in*batch in, n_out*batch out) -- no padded slabs.
    xt = x.T.astype(jnp.float32)                       # (d_in, batch)

    # Balanced batch tiles; >= 2 grid steps when batch allows it so the
    # "parallel" axis can shard across both v7x TensorCores (no effect on
    # single-TC v5e/v6e).  Avoids wasting a near-full remainder tile.
    n_steps = max(1, pl.cdiv(batch, block_batch))
    if batch > LANE:
        n_steps = max(n_steps, 2)
    tb = _round_up(pl.cdiv(batch, n_steps), LANE)
    padded_batch = _round_up(batch, tb)
    if padded_batch != batch:
        xt = jnp.pad(xt, ((0, 0), (0, padded_batch - batch)))
    grid = (padded_batch // tb,)

    out = pl.pallas_call(
        functools.partial(netg_kernel, res_sizes=tuple(res_sizes)),
        out_shape=jax.ShapeDtypeStruct((n_out, padded_batch), jnp.float32),
        grid_spec=pltpu.PrefetchScalarGridSpec(
            num_scalar_prefetch=0,
            grid=grid,
            in_specs=[
                pl.BlockSpec((d_in, tb), lambda i: (0, i)),         # activations
                pl.BlockSpec(w_packed.shape, lambda i: (0, 0, 0)),  # weights (resident)
                pl.BlockSpec(b_packed.shape, lambda i: (0, 0, 0)),  # biases  (resident)
            ],
            out_specs=pl.BlockSpec((n_out, tb), lambda i: (0, i)),
            scratch_shapes=[pltpu.VMEM((FEAT_PAD, tb), jnp.float32)],
        ),
        compiler_params=pltpu.CompilerParams(
            dimension_semantics=("parallel",),
            vmem_limit_bytes=32 * 1024 * 1024,   # tiny working set; safe on v5e/v6e/v7x
        ),
    )(xt, w_packed, b_packed)

    return out[:, :batch].T                            # (batch, n_out)


def init_netg_params(key, res_sizes=RES_SIZES):
    """Deterministic init mimicking nn.Linear default uniform(-k, k), k = 1/sqrt(fan_in)."""
    params = []
    for (n_in, n_out) in res_sizes:
        key, k1, k2, k3, k4 = jax.random.split(key, 5)
        lim1 = 1.0 / np.sqrt(n_in)
        lim2 = 1.0 / np.sqrt(n_out)
        wa = jax.random.uniform(k1, (n_in, n_out), jnp.float32, -lim1, lim1)
        ba = jax.random.uniform(k2, (n_out,), jnp.float32, -lim1, lim1)
        wb = jax.random.uniform(k3, (n_out, n_out), jnp.float32, -lim2, lim2)
        bb = jax.random.uniform(k4, (n_out,), jnp.float32, -lim2, lim2)
        params.append((wa, ba))
        params.append((wb, bb))
    return params


def netg_reference(x, params, res_sizes=RES_SIZES, matmul_dtype=None):
    """Pure-JAX reference with the exact module semantics.  If matmul_dtype is
    given, matmul inputs are cast to it (to match the bf16 MXU path)."""
    def dot(a, w):
        if matmul_dtype is not None:
            a = a.astype(matmul_dtype)
            w = w.astype(matmul_dtype)
        return jnp.dot(a, w, preferred_element_type=jnp.float32,
                       precision=jax.lax.Precision.HIGHEST)

    h = x
    for r, (n_in, n_out) in enumerate(res_sizes):
        (wa, ba), (wb, bb) = params[2 * r], params[2 * r + 1]
        skip = h[:, : min(n_in, n_out)]
        if n_out > n_in:
            skip = jnp.pad(skip, ((0, 0), (0, n_out - n_in)))
        t = jnp.maximum(dot(h, wa) + ba, 0.0) ** 2
        t = jnp.maximum(dot(t, wb) + bb, 0.0) ** 2
        h = t + skip
    return h


if __name__ == "__main__":
    res_sizes = RES_SIZES
    batch = 200   # small; exercises 2 grid steps ("parallel" split) + batch padding

    key = jax.random.PRNGKey(0)
    kx, kp = jax.random.split(key)
    x = 0.5 * jax.random.normal(kx, (batch, res_sizes[0][0]), jnp.float32)
    params = init_netg_params(kp, res_sizes)

    # 1) Optimized bf16-MXU path (f32 accumulate / bias / relu^2 / skip),
    #    checked against a reference that applies the same bf16 casts to the
    #    matmul inputs -> tight tolerance.
    w_bf16, b_bf16 = pack_netg_params(params, res_sizes, matmul_dtype=jnp.bfloat16)
    out_bf16 = jax.block_until_ready(netg_forward(x, w_bf16, b_bf16, res_sizes))
    assert out_bf16.shape == (batch, res_sizes[-1][1])
    ref_bf16 = netg_reference(x, params, res_sizes, matmul_dtype=jnp.bfloat16)
    np.testing.assert_allclose(np.asarray(out_bf16), np.asarray(ref_bf16),
                               rtol=1e-4, atol=1e-4)

    # 2) f32-weight path vs exact module semantics.  Loose band only: in-kernel
    #    f32 MXU emulation precision is not required to bit-match
    #    Precision.HIGHEST (review correctness note).
    w_f32, b_f32 = pack_netg_params(params, res_sizes, matmul_dtype=jnp.float32)
    out_f32 = jax.block_until_ready(netg_forward(x, w_f32, b_f32, res_sizes))
    ref_f32 = netg_reference(x, params, res_sizes, matmul_dtype=None)
    np.testing.assert_allclose(np.asarray(out_f32), np.asarray(ref_f32),
                               rtol=2e-2, atol=2e-2)

    print("KERNEL_OK")
</pallas_src>

<mosaic_0001>
module attributes {stable_mosaic.version = 11 : i64} {
  func.func @netg_kernel(%arg0: i32, %arg1: memref<2x128xf32, #tpu.memory_space<vmem>>, %arg2: memref<6x16x16xbf16, #tpu.memory_space<vmem>>, %arg3: memref<6x16x1xf32, #tpu.memory_space<vmem>>, %arg4: memref<1x128xf32, #tpu.memory_space<vmem>>, %arg5: memref<16x128xf32, #tpu.memory_space<vmem>>) attributes {dimension_semantics = [#tpu.dimension_semantics<parallel>], iteration_bounds = array<i64: 2>, scalar_prefetch = 0 : i64, scratch_operands = 1 : i64, tpu.core_type = #tpu.core_type<tc>, window_params = [{transform_indices = @transform_0, window_bounds = array<i64: 2, 128>}, {pipeline_mode = #tpu.pipeline_mode<synchronous>, transform_indices = @transform_1, window_bounds = array<i64: 6, 16, 16>}, {pipeline_mode = #tpu.pipeline_mode<synchronous>, transform_indices = @transform_2, window_bounds = array<i64: 6, 16, 1>}, {transform_indices = @transform_3, window_bounds = array<i64: 1, 128>}]} {
    %cst = arith.constant 0.000000e+00 : f32
    %0 = vector.broadcast %cst : f32 to vector<16x128xf32>
    %c0 = arith.constant 0 : index
    %c0_0 = arith.constant 0 : index
    %1 = vector.load %arg5[%c0, %c0_0] : memref<16x128xf32, #tpu.memory_space<vmem>>, vector<16x128xf32>
    tpu.vector_store %arg5[%c0, %c0_0], %0 {strides = array<i32>} : memref<16x128xf32, #tpu.memory_space<vmem>>, vector<16x128xf32>,
    %c0_1 = arith.constant 0 : index
    %c0_2 = arith.constant 0 : index
    %2 = vector.load %arg1[%c0_1, %c0_2] : memref<2x128xf32, #tpu.memory_space<vmem>>, vector<2x128xf32>
    %c0_3 = arith.constant 0 : index
    %c0_4 = arith.constant 0 : index
    %3 = vector.load %arg5[%c0_3, %c0_4] : memref<16x128xf32, #tpu.memory_space<vmem>>, vector<2x128xf32>
    tpu.vector_store %arg5[%c0_3, %c0_4], %2 {strides = array<i32>} : memref<16x128xf32, #tpu.memory_space<vmem>>, vector<2x128xf32>,
    %c0_5 = arith.constant 0 : index
    %c0_6 = arith.constant 0 : index
    %4 = vector.load %arg5[%c0_5, %c0_6] : memref<16x128xf32, #tpu.memory_space<vmem>>, vector<16x128xf32>
    %c0_7 = arith.constant 0 : index
    %c0_8 = arith.constant 0 : index
    %c0_9 = arith.constant 0 : index
    %5 = vector.load %arg2[%c0_7, %c0_8, %c0_9] : memref<6x16x16xbf16, #tpu.memory_space<vmem>>, vector<1x16x16xbf16>
    %6 = vector.shape_cast %5 : vector<1x16x16xbf16> to vector<16x16xbf16>
    %c0_10 = arith.constant 0 : index
    %c0_11 = arith.constant 0 : index
    %c0_12 = arith.constant 0 : index
    %7 = vector.load %arg3[%c0_10, %c0_11, %c0_12] : memref<6x16x1xf32, #tpu.memory_space<vmem>>, vector<1x16x1xf32>
    %8 = vector.shape_cast %7 : vector<1x16x1xf32> to vector<16x1xf32>
    %c1 = arith.constant 1 : index
    %c0_13 = arith.constant 0 : index
    %c0_14 = arith.constant 0 : index
    %9 = vector.load %arg2[%c1, %c0_13, %c0_14] : memref<6x16x16xbf16, #tpu.memory_space<vmem>>, vector<1x16x16xbf16>
    %10 = vector.shape_cast %9 : vector<1x16x16xbf16> to vector<16x16xbf16>
    %c1_15 = arith.constant 1 : index
    %c0_16 = arith.constant 0 : index
    %c0_17 = arith.constant 0 : index
    %11 = vector.load %arg3[%c1_15, %c0_16, %c0_17] : memref<6x16x1xf32, #tpu.memory_space<vmem>>, vector<1x16x1xf32>
    %12 = vector.shape_cast %11 : vector<1x16x1xf32> to vector<16x1xf32>
    %13 = arith.truncf %4 : vector<16x128xf32> to vector<16x128xbf16>
    %cst_18 = arith.constant dense<0.000000e+00> : vector<16x128xf32>
    %14 = tpu.matmul %6, %13, %cst_18 {dimension_numbers = #tpu.dot_dimension_numbers<[1], [0], [0], [1], [0, 0, 1, 1], [], []>} : vector<16x16xbf16>, vector<16x128xbf16>, vector<16x128xf32> -> vector<16x128xf32>
    %15 = vector.broadcast %8 : vector<16x1xf32> to vector<16x128xf32>
    %16 = arith.addf %14, %15 : vector<16x128xf32>
    %cst_19 = arith.constant 0.000000e+00 : f32
    %17 = vector.broadcast %cst_19 : f32 to vector<16x128xf32>
    %18 = arith.maximumf %16, %17 : vector<16x128xf32>
    %19 = arith.mulf %18, %18 : vector<16x128xf32>
    %20 = arith.truncf %19 : vector<16x128xf32> to vector<16x128xbf16>
    %cst_20 = arith.constant dense<0.000000e+00> : vector<16x128xf32>
    %21 = tpu.matmul %10, %20, %cst_20 {dimension_numbers = #tpu.dot_dimension_numbers<[1], [0], [0], [1], [0, 0, 1, 1], [], []>} : vector<16x16xbf16>, vector<16x128xbf16>, vector<16x128xf32> -> vector<16x128xf32>
    %22 = vector.broadcast %12 : vector<16x1xf32> to vector<16x128xf32>
    %23 = arith.addf %21, %22 : vector<16x128xf32>
    %cst_21 = arith.constant 0.000000e+00 : f32
    %24 = vector.broadcast %cst_21 : f32 to vector<16x128xf32>
    %25 = arith.maximumf %23, %24 : vector<16x128xf32>
    %26 = arith.mulf %25, %25 : vector<16x128xf32>
    %27 = arith.addf %26, %4 : vector<16x128xf32>
    %c2 = arith.constant 2 : index
    %c0_22 = arith.constant 0 : index
    %c0_23 = arith.constant 0 : index
    %28 = vector.load %arg2[%c2, %c0_22, %c0_23] : memref<6x16x16xbf16, #tpu.memory_space<vmem>>, vector<1x16x16xbf16>
    %29 = vector.shape_cast %28 : vector<1x16x16xbf16> to vector<16x16xbf16>
    %c2_24 = arith.constant 2 : index
    %c0_25 = arith.constant 0 : index
    %c0_26 = arith.constant 0 : index
    %30 = vector.load %arg3[%c2_24, %c0_25, %c0_26] : memref<6x16x1xf32, #tpu.memory_space<vmem>>, vector<1x16x1xf32>
    %31 = vector.shape_cast %30 : vector<1x16x1xf32> to vector<16x1xf32>
    %c3 = arith.constant 3 : index
    %c0_27 = arith.constant 0 : index
    %c0_28 = arith.constant 0 : index
    %32 = vector.load %arg2[%c3, %c0_27, %c0_28] : memref<6x16x16xbf16, #tpu.memory_space<vmem>>, vector<1x16x16xbf16>
    %33 = vector.shape_cast %32 : vector<1x16x16xbf16> to vector<16x16xbf16>
    %c3_29 = arith.constant 3 : index
    %c0_30 = arith.constant 0 : index
    %c0_31 = arith.constant 0 : index
    %34 = vector.load %arg3[%c3_29, %c0_30, %c0_31] : memref<6x16x1xf32, #tpu.memory_space<vmem>>, vector<1x16x1xf32>
    %35 = vector.shape_cast %34 : vector<1x16x1xf32> to vector<16x1xf32>
    %36 = arith.truncf %27 : vector<16x128xf32> to vector<16x128xbf16>
    %cst_32 = arith.constant dense<0.000000e+00> : vector<16x128xf32>
    %37 = tpu.matmul %29, %36, %cst_32 {dimension_numbers = #tpu.dot_dimension_numbers<[1], [0], [0], [1], [0, 0, 1, 1], [], []>} : vector<16x16xbf16>, vector<16x128xbf16>, vector<16x128xf32> -> vector<16x128xf32>
    %38 = vector.broadcast %31 : vector<16x1xf32> to vector<16x128xf32>
    %39 = arith.addf %37, %38 : vector<16x128xf32>
    %cst_33 = arith.constant 0.000000e+00 : f32
    %40 = vector.broadcast %cst_33 : f32 to vector<16x128xf32>
    %41 = arith.maximumf %39, %40 : vector<16x128xf32>
    %42 = arith.mulf %41, %41 : vector<16x128xf32>
    %43 = arith.truncf %42 : vector<16x128xf32> to vector<16x128xbf16>
    %cst_34 = arith.constant dense<0.000000e+00> : vector<16x128xf32>
    %44 = tpu.matmul %33, %43, %cst_34 {dimension_numbers = #tpu.dot_dimension_numbers<[1], [0], [0], [1], [0, 0, 1, 1], [], []>} : vector<16x16xbf16>, vector<16x128xbf16>, vector<16x128xf32> -> vector<16x128xf32>
    %45 = vector.broadcast %35 : vector<16x1xf32> to vector<16x128xf32>
    %46 = arith.addf %44, %45 : vector<16x128xf32>
    %cst_35 = arith.constant 0.000000e+00 : f32
    %47 = vector.broadcast %cst_35 : f32 to vector<16x128xf32>
    %48 = arith.maximumf %46, %47 : vector<16x128xf32>
    %49 = arith.mulf %48, %48 : vector<16x128xf32>
    %50 = arith.addf %49, %27 : vector<16x128xf32>
    %51 = tpu.iota {dimensions = array<i32: 0>} : vector<16x128xi32>
    %c1_i32 = arith.constant 1 : i32
    %52 = vector.broadcast %c1_i32 : i32 to vector<16x128xi32>
    %53 = arith.cmpi slt, %51, %52 : vector<16x128xi32>
    %cst_36 = arith.constant 0.000000e+00 : f32
    %54 = vector.broadcast %cst_36 : f32 to vector<16x128xf32>
    %55 = arith.select %53, %50, %54 : vector<16x128xi1>, vector<16x128xf32>
    %c4 = arith.constant 4 : index
    %c0_37 = arith.constant 0 : index
    %c0_38 = arith.constant 0 : index
    %56 = vector.load %arg2[%c4, %c0_37, %c0_38] : memref<6x16x16xbf16, #tpu.memory_space<vmem>>, vector<1x16x16xbf16>
    %57 = vector.shape_cast %56 : vector<1x16x16xbf16> to vector<16x16xbf16>
    %c4_39 = arith.constant 4 : index
    %c0_40 = arith.constant 0 : index
    %c0_41 = arith.constant 0 : index
    %58 = vector.load %arg3[%c4_39, %c0_40, %c0_41] : memref<6x16x1xf32, #tpu.memory_space<vmem>>, vector<1x16x1xf32>
    %59 = vector.shape_cast %58 : vector<1x16x1xf32> to vector<16x1xf32>
    %c5 = arith.constant 5 : index
    %c0_42 = arith.constant 0 : index
    %c0_43 = arith.constant 0 : index
    %60 = vector.load %arg2[%c5, %c0_42, %c0_43] : memref<6x16x16xbf16, #tpu.memory_space<vmem>>, vector<1x16x16xbf16>
    %61 = vector.shape_cast %60 : vector<1x16x16xbf16> to vector<16x16xbf16>
    %c5_44 = arith.constant 5 : index
    %c0_45 = arith.constant 0 : index
    %c0_46 = arith.constant 0 : index
    %62 = vector.load %arg3[%c5_44, %c0_45, %c0_46] : memref<6x16x1xf32, #tpu.memory_space<vmem>>, vector<1x16x1xf32>
    %63 = vector.shape_cast %62 : vector<1x16x1xf32> to vector<16x1xf32>
    %64 = arith.truncf %50 : vector<16x128xf32> to vector<16x128xbf16>
    %cst_47 = arith.constant dense<0.000000e+00> : vector<16x128xf32>
    %65 = tpu.matmul %57, %64, %cst_47 {dimension_numbers = #tpu.dot_dimension_numbers<[1], [0], [0], [1], [0, 0, 1, 1], [], []>} : vector<16x16xbf16>, vector<16x128xbf16>, vector<16x128xf32> -> vector<16x128xf32>
    %66 = vector.broadcast %59 : vector<16x1xf32> to vector<16x128xf32>
    %67 = arith.addf %65, %66 : vector<16x128xf32>
    %cst_48 = arith.constant 0.000000e+00 : f32
    %68 = vector.broadcast %cst_48 : f32 to vector<16x128xf32>
    %69 = arith.maximumf %67, %68 : vector<16x128xf32>
    %70 = arith.mulf %69, %69 : vector<16x128xf32>
    %71 = arith.truncf %70 : vector<16x128xf32> to vector<16x128xbf16>
    %cst_49 = arith.constant dense<0.000000e+00> : vector<16x128xf32>
    %72 = tpu.matmul %61, %71, %cst_49 {dimension_numbers = #tpu.dot_dimension_numbers<[1], [0], [0], [1], [0, 0, 1, 1], [], []>} : vector<16x16xbf16>, vector<16x128xbf16>, vector<16x128xf32> -> vector<16x128xf32>
    %73 = vector.broadcast %63 : vector<16x1xf32> to vector<16x128xf32>
    %74 = arith.addf %72, %73 : vector<16x128xf32>
    %cst_50 = arith.constant 0.000000e+00 : f32
    %75 = vector.broadcast %cst_50 : f32 to vector<16x128xf32>
    %76 = arith.maximumf %74, %75 : vector<16x128xf32>
    %77 = arith.mulf %76, %76 : vector<16x128xf32>
    %78 = arith.addf %77, %55 : vector<16x128xf32>
    %79 = vector.extract_strided_slice %78 {offsets = [0, 0], sizes = [1, 128], strides = [1, 1]} : vector<16x128xf32> to vector<1x128xf32>
    %c0_51 = arith.constant 0 : index
    %c0_52 = arith.constant 0 : index
    %80 = vector.load %arg4[%c0_51, %c0_52] : memref<1x128xf32, #tpu.memory_space<vmem>>, vector<1x128xf32>
    tpu.vector_store %arg4[%c0_51, %c0_52], %79 {strides = array<i32>} : memref<1x128xf32, #tpu.memory_space<vmem>>, vector<1x128xf32>,
    return
  }
  func.func @transform_0(%arg0: i32) -> (i32, i32) {
    %c0_i32 = arith.constant 0 : i32
    %c0_i32_0 = arith.constant 0 : i32
    return %c0_i32, %arg0 : i32, i32
  }
  func.func @transform_1(%arg0: i32) -> (i32, i32, i32) {
    %c0_i32 = arith.constant 0 : i32
    %c0_i32_0 = arith.constant 0 : i32
    %c0_i32_1 = arith.constant 0 : i32
    %c0_i32_2 = arith.constant 0 : i32
    return %c0_i32, %c0_i32_0, %c0_i32_1 : i32, i32, i32
  }
  func.func @transform_2(%arg0: i32) -> (i32, i32, i32) {
    %c0_i32 = arith.constant 0 : i32
    %c0_i32_0 = arith.constant 0 : i32
    %c0_i32_1 = arith.constant 0 : i32
    %c0_i32_2 = arith.constant 0 : i32
    return %c0_i32, %c0_i32_0, %c0_i32_1 : i32, i32, i32
  }
  func.func @transform_3(%arg0: i32) -> (i32, i32) {
    %c0_i32 = arith.constant 0 : i32
    %c0_i32_0 = arith.constant 0 : i32
    return %c0_i32, %arg0 : i32, i32
  }
}

</mosaic_0001>

<bundles_post_ra>
// kernel: tpu_custom_call.1
= control target key start
LH: loop header
LB: loop body
LE: loop exit
PB: predicated region body
PF: predicated region fallthrough
CT: control target
= control target key end

     0   :  { %8 = vsyncpa [#allocation4], 0  ;;  %s1068_s0 = inlined_call_operand.vmem [shape: f32[2,256], index: 0, kind: input, shape index: {}]   ;;  %s1069_s1 = inlined_call_operand.vmem [shape: bf16[6,16,16], index: 1, kind: input, shape index: {}]   ;;  %s1070_s2 = inlined_call_operand.vmem [shape: f32[6,16,1], index: 2, kind: input, shape index: {}]   ;;  %s1071_s3 = inlined_call_operand.hbm [shape: f32[1,256], index: 3, kind: output, shape index: {}]  }
   0x1   :  { %10 = vsyncpa [#allocation4 + $0x1], 0  ;;  %s891_s12 = smov 0   ;;  %s893_s13 = smov 0  }
   0x2   :  { %s895_s14 = smov 0   ;;  %s897_s15 = smov 0  }
   0x3 LB: > { %s912_s16 = sadd.s32 4294967295, %s865_s15   ;;  %s665_s17 = sadd.s32 4294967294, %s865_s15   ;;  %s865_s15 = sphi %s897_s15, %s1077_s15   ;;  %s861_s14 = sphi %s895_s14, %s1076_s14   ;;  %s857_s13 = sphi %s893_s13, %s1075_s13   ;;  %s853_s12 = sphi %s891_s12, %s1074_s12  }
   0x4   : > { %s916_s18 = sadd.s32 1, %s865_s15   ;;  %s91_s19 = sadd.s32 1, %s861_s14 }
   0x5   : > { %s88_s20 = ssub.s32 %s865_s15, %s916_s18  ;;  %p101_p0 = scmp.ne.s32.totalorder %s861_s14, %s857_s13 }
   0x6   : > { %p89_p1 = scmp.eq.s32.totalorder %s88_s20, 0  ;;  %p102_p2 = scmp.eq.s32.totalorder %s912_s16, 1 }
   0x7   : > { %p107_p3 = scmp.ne.s32.totalorder %s857_s13, %s853_s12  ;;  %p108_p4 = scmp.eq.s32.totalorder %s665_s17, 1 }
   0x8   : > { %s927_s21 = scalar_select %p89_p1, %s861_s14, %s91_s19  }
   0x9   : > { %p929_p5 = por %p102_p2, %p101_p0  ;;  %p933_p6 = por %p108_p4, %p107_p3 }
   0xa   : > { %p668_p7 = scmp.ge.s32.totalorder %s865_s15, 1  ;;  %p139_p8 = scmp.lt.s32.totalorder %s865_s15, 3 }
   0xc   : > { %p140_p9 = pnand %p668_p7, %p139_p8 }
   0xd   : > { %p161_p10 = scmp.lt.s32.totalorder (!%p140_p9), %s912_s16, 1  ;;  %v867_v0 = vmov (!%p140_p9), 0.0   ;;  %vm868_vm0 = vmmov (!%p140_p9), 0   ;;  %v174_v1 = vld [vmem:[%s1070_s2] sm:$0xff] (!%p140_p9)  ;;  %v869_v2 = vmov (!%p140_p9), 0   ;;  %v175_v3 = vld [vmem:[%s1070_s2 + $0x8] sm:$0xff] (!%p140_p9) }
   0xe   : > { %143 = sbr.rel (%p140_p9) target bundleno = 1400 (0x578), region = 32  ;;  %717 = vmatprep.subr.bf16.mxu0 (!%p140_p9), %v867_v0  ;;  %166 = vst [vmem:[#allocation2] sm:$0xff] (!%p140_p9), %v867_v0  ;;  %719 = vmatprep.mubr.msk.bf16.mxu0 (!%p140_p9), %vm868_vm0, %v867_v0  ;;  %v680_v5 = vld [vmem:[%s1070_s2 + $0x20] sm:$0xff] (!%p140_p9)  ;;  %v684_v6 = vld [vmem:[%s1070_s2 + $0x30] sm:$0xff] (!%p140_p9)  ;;  %vm198_vm1 = vcmask (!%p140_p9), 130048   ;;  %v673_v13 = vld [vmem:[%s1070_s2 + $0x18] sm:$0xff] (!%p140_p9) }
   0xf   : > { %795 = vset.pattern.permute.xlu0 (!%p140_p9), %v869_v2  ;;  %723 = vmatprep.subr.bf16.mxu1 (!%p140_p9), %v867_v0  ;;  %v797_v9 = vld [vmem:[%s1069_s1] sm:$0xff] (!%p140_p9)   ;;  %v696_v11 = vld [vmem:[%s1070_s2 + $0x50] sm:$0xff] (!%p140_p9)  ;;  %v681_v14 = vld [vmem:[%s1070_s2 + $0x28] sm:$0xff] (!%p140_p9)  ;;  %s702_s28 = sshll.u32 (!%p140_p9), %s912_s16, 4 }
  0x10   : > { %185 = vperm.xlu0 (!%p140_p9), %795, %v174_v1   ;;  %725 = vmatprep.mubr.msk.bf16.mxu1 (!%p140_p9), %vm868_vm0, %v867_v0  ;;  %v692_v10 = vld [vmem:[%s1070_s2 + $0x40] sm:$0xff] (!%p140_p9)  ;;  %v672_v12 = vld [vmem:[%s1070_s2 + $0x10] sm:$0xff] (!%p140_p9)  ;;  %v685_v15 = vld [vmem:[%s1070_s2 + $0x38] sm:$0xff] (!%p140_p9)  ;;  %s1026_s6 = scalar_lea.hbm (!%p140_p9), %s1071_s3, %s702_s28 }
  0x11   : > { %796 = vset.pattern.permute.xlu1 (!%p140_p9), %v869_v2  ;;  %v693_v16 = vld [vmem:[%s1070_s2 + $0x48] sm:$0xff] (!%p140_p9)  ;;  %v799_v45 = vld [vmem:[%s1069_s1 + $0x10] sm:$0xff] (!%p140_p9)   ;;  %v800_v59 = vld [vmem:[%s1069_s1 + $0x18] sm:$0xff] (!%p140_p9)  }
  0x12   : > { %250 = vperm.xlu1 (!%p140_p9), %796, %v672_v12   ;;  %v798_v30 = vld [vmem:[%s1069_s1 + $0x8] sm:$0xff] (!%p140_p9)   ;;  %v801_v12 = vld [vmem:[%s1069_s1 + $0x20] sm:$0xff] (!%p140_p9)  }
  0x14   : > { %190 = vperm.xlu0 (!%p140_p9), %795, %v175_v3  }
  0x15   : > { %s162_s26 = scalar_select %p161_p10, %s912_s16, 1 }
  0x16   : > { %255 = vperm.xlu1 %796, %v673_v13   ;;  %s870_s16 = smov [#allocation3]  }
  0x17   : > { %s669_s27 = sshll.u32 %s162_s26, 1  ;;  %s807_s9 = sshll.u32 %s870_s16, 4  ;;  %s808_s9 = int_to_ptr.vmem [resolvable:$false] %s807_s9 }
  0x18   : > { %s164_s5 = scalar_lea.vmem %s1068_s0, %s669_s27  ;;  %328 = vperm.xlu0 %795, %v680_v5   ;;  %s159_s27 = sand.u32 1, %s857_s13  }
  0x19   : > { %v168_v4 = vld [vmem:[%s164_s5] sm:$0x3]  ;;  %s160_s29 = scalar_lea.vmem [#allocation3], %s159_s27  ;;  %s598_s7 = scalar_lea.sflag [#allocation4], %s159_s27 }
  0x1a   : > { %169 = vst [vmem:[#allocation2] sm:$0x3] %v168_v4  ;;  %333 = vperm.xlu1 %796, %v681_v14   ;;  %s610_s30 = sshll.u32 %s160_s29, 4  ;;  %s809_s10 = scalar_lea.vmem %s808_s9, 32  ;;  %s1028_s30 = int_to_ptr.vmem [resolvable:$true] %s610_s30 }
  0x1b   : > { %s803_s8 = scalar_lea.vmem %s1028_s30, 16  ;;  %p810_p0 = scmp.lt.s32.totalorder %s1028_s30, %s808_s9 }
  0x1c   : > { %392 = vperm.xlu0 %795, %v684_v6   ;;  %p804_p11 = scmp.ne.s32.totalorder %s1028_s30, %s803_s8  ;;  %p811_p1 = scmp.lt.s32.totalorder %s809_s10, %s803_s8 }
  0x1e   : > { %397 = vperm.xlu1 %796, %v685_v15   ;;  %p805_p12 = pnand %p804_p11, %p929_p5  ;;  %p812_p2 = por %p811_p1, %p810_p0 }
  0x20   : > { %474 = vperm.xlu0 %795, %v692_v10   ;;  %p806_p13 = pneg %p805_p12 }
  0x21   : > { %v170_v7 = vld [vmem:[#allocation2] sm:$0xff] }
  0x22   : > { %v182_v8 = vpack.c.bf16 %v867_v0, %v170_v7  ;;  %479 = vperm.xlu1 %796, %v693_v16   ;;  %p813_p3 = pnand %p812_p2, %p806_p13 }
  0x24   : > { %718 = vmatpush3.bf16.msra.mxu0 %v182_v8  ;;  %538 = vperm.xlu0 %795, %v696_v11  }
  0x25   : > { %729 = vmatprep.subr.bf16.mxu0 %v867_v0 }
  0x27   : > { %720 = vmatmul.mubr.msk.bf16.vlgmr.msra.gmra.mrb[0].mxu0 %vm198_vm1, %v797_v9 }
  0x28   : > { %731 = vmatprep.mubr.msk.bf16.mxu0 %vm868_vm0, %v867_v0 }
  0x8f   : > { %v186_v17 = vpop.permute.xlu0 %185 }
  0x91   : > { %v251_v31 = vpop.permute.xlu1 %250 }
  0x93   : > { %v191_v21 = vpop.permute.xlu0 %190 }
  0x95   : > { %v256_v35 = vpop.permute.xlu1 %255 }
  0x97   : > { %v329_v46 = vpop.permute.xlu0 %328 }
  0x99   : > { %v334_v50 = vpop.permute.xlu1 %333 }
  0x9b   : > { %v393_v60 = vpop.permute.xlu0 %392 }
  0x9d   : > { %v398_v1 = vpop.permute.xlu1 %397 }
  0xa1   : > { %v480_v16 = vpop.permute.xlu1 %479 }
  0xfa   : > { %v236_v18 = vpop.f32.mrb[0].mxu0 }
  0xfb   : > { %v237_v19 = vadd.f32 %v236_v18, %v186_v17  ;;  %v721_v20 = vpop.f32.mrb[1].mxu0 }
  0xfc   : > { %v239_v22 = vpop.f32.mrb[2].mxu0 }
  0xfd   : > { %v243_v23 = vmax.f32 %v237_v19, 0.0  ;;  %v240_v24 = vadd.f32 %v239_v22, %v191_v21  ;;  %v722_v25 = vpop.f32.mrb[3].mxu0 }
  0xfe   : > { %v802_v25 = vld [vmem:[%s1069_s1 + $0x28] sm:$0xff]  }
  0xff   : > { %v244_v26 = vmax.f32 %v240_v24, 0.0  ;;  %v245_v27 = vmul.f32 %v243_v23, %v243_v23 }
 0x101   : > { %v246_v28 = vmul.f32 %v244_v26, %v244_v26  ;;  %v455_v26 = vlaneseq }
 0x103   : > { %v247_v29 = vpack.c.bf16 %v246_v28, %v245_v27  ;;  %v456_v27 = vshrl.u32 %v455_v26, 7 }
 0x105   : > { %724 = vmatpush3.bf16.msra.mxu1 %v247_v29  ;;  %vm457_vm2 = vcmp.lt.s32.totalorder %v456_v27, 1 }
 0x106   : > { %735 = vmatprep.subr.bf16.mxu1 %v867_v0 }
 0x108   : > { %726 = vmatmul.mubr.msk.bf16.vlgmr.msra.gmra.mrb[0].mxu1 %vm198_vm1, %v798_v30 }
 0x109   : > { %737 = vmatprep.mubr.msk.bf16.mxu1 %vm868_vm0, %v867_v0 }
 0x1db   : > { %v300_v32 = vpop.f32.mrb[0].mxu1 }
 0x1dc   : > { %v301_v33 = vadd.f32 %v300_v32, %v251_v31  ;;  %v727_v34 = vpop.f32.mrb[1].mxu1 }
 0x1dd   : > { %v303_v36 = vpop.f32.mrb[2].mxu1 }
 0x1de   : > { %v307_v37 = vmax.f32 %v301_v33, 0.0  ;;  %v304_v38 = vadd.f32 %v303_v36, %v256_v35  ;;  %v728_v39 = vpop.f32.mrb[3].mxu1 }
 0x1e0   : > { %v309_v40 = vmul.f32 %v307_v37, %v307_v37  ;;  %v308_v41 = vmax.f32 %v304_v38, 0.0 }
 0x1e2   : > { %v310_v42 = vmul.f32 %v308_v41, %v308_v41  ;;  %v311_v43 = vadd.f32 %v309_v40, %v170_v7 }
 0x1e4   : > { %v325_v44 = vpack.c.bf16 %v310_v42, %v311_v43 }
 0x1e6   : > { %730 = vmatpush3.bf16.msra.mxu0 %v325_v44 }
 0x1e7   : > { %741 = vmatprep.subr.bf16.mxu0 %v867_v0 }
 0x1e9   : > { %732 = vmatmul.mubr.msk.bf16.vlgmr.msra.gmra.mrb[4].mxu0 %vm198_vm1, %v799_v45 }
 0x1ea   : > { %743 = vmatprep.mubr.msk.bf16.mxu0 %vm868_vm0, %v867_v0 }
 0x2bc   : > { %v378_v47 = vpop.f32.mrb[4].mxu0 }
 0x2bd   : > { %v379_v48 = vadd.f32 %v378_v47, %v329_v46  ;;  %v733_v49 = vpop.f32.mrb[5].mxu0 }
 0x2be   : > { %v381_v51 = vpop.f32.mrb[6].mxu0 }
 0x2bf   : > { %v385_v52 = vmax.f32 %v379_v48, 0.0  ;;  %v382_v53 = vadd.f32 %v381_v51, %v334_v50  ;;  %v734_v54 = vpop.f32.mrb[7].mxu0 }
 0x2c1   : > { %v386_v55 = vmax.f32 %v382_v53, 0.0  ;;  %v387_v56 = vmul.f32 %v385_v52, %v385_v52 }
 0x2c3   : > { %v388_v57 = vmul.f32 %v386_v55, %v386_v55 }
 0x2c5   : > { %v389_v58 = vpack.c.bf16 %v388_v57, %v387_v56 }
 0x2c7   : > { %736 = vmatpush3.bf16.msra.mxu1 %v389_v58 }
 0x2c8   : > { %747 = vmatprep.subr.bf16.mxu1 %v867_v0 }
 0x2ca   : > { %738 = vmatmul.mubr.msk.bf16.vlgmr.msra.gmra.mrb[4].mxu1 %vm198_vm1, %v800_v59 }
 0x2cb   : > { %749 = vmatprep.mubr.msk.bf16.mxu1 %vm868_vm0, %v867_v0  ;;  %v475_v0 = vpop.permute.xlu0 %474 }
 0x2cf   : > { %v539_v28 = vpop.permute.xlu0 %538 }
 0x39d   : > { %v442_v61 = vpop.f32.mrb[4].mxu1 }
 0x39e   : > { %v443_v62 = vadd.f32 %v442_v61, %v393_v60  ;;  %v739_v63 = vpop.f32.mrb[5].mxu1 }
 0x39f   : > { %v445_v2 = vpop.f32.mrb[6].mxu1 }
 0x3a0   : > { %v449_v3 = vmax.f32 %v443_v62, 0.0  ;;  %v446_v4 = vadd.f32 %v445_v2, %v398_v1  ;;  %v740_v5 = vpop.f32.mrb[7].mxu1 }
 0x3a2   : > { %v451_v6 = vmul.f32 %v449_v3, %v449_v3  ;;  %v450_v7 = vmax.f32 %v446_v4, 0.0 }
 0x3a4   : > { %v452_v8 = vmul.f32 %v450_v7, %v450_v7  ;;  %v453_v9 = vadd.f32 %v451_v6, %v311_v43 }
 0x3a6   : > { %v454_v10 = vadd.f32 %v452_v8, %v310_v42  ;;  %v458_v36 = vsel %vm457_vm2, %v453_v9, 0.0 }
 0x3a8   : > { %v471_v11 = vpack.c.bf16 %v454_v10, %v453_v9 }
 0x3aa   : > { %742 = vmatpush3.bf16.msra.mxu0 %v471_v11 }
 0x3ad   : > { %744 = vmatmul.mubr.msk.bf16.vlgmr.msra.gmra.mrb[8].mxu0 %vm198_vm1, %v801_v12 }
 0x480   : > { %v524_v13 = vpop.f32.mrb[8].mxu0 }
 0x481   : > { %v525_v14 = vadd.f32 %v524_v13, %v475_v0  ;;  %v745_v15 = vpop.f32.mrb[9].mxu0 }
 0x482   : > { %v527_v17 = vpop.f32.mrb[10].mxu0 }
 0x483   : > { %v531_v18 = vmax.f32 %v525_v14, 0.0  ;;  %v528_v19 = vadd.f32 %v527_v17, %v480_v16  ;;  %v746_v20 = vpop.f32.mrb[11].mxu0 }
 0x485   : > { %v532_v21 = vmax.f32 %v528_v19, 0.0  ;;  %v533_v22 = vmul.f32 %v531_v18, %v531_v18 }
 0x487   : > { %v534_v23 = vmul.f32 %v532_v21, %v532_v21 }
 0x489   : > { %v535_v24 = vpack.c.bf16 %v534_v23, %v533_v22 }
 0x48b   : > { %748 = vmatpush3.bf16.msra.mxu1 %v535_v24 }
 0x48e   : > { %750 = vmatmul.mubr.msk.bf16.vlgmr.msra.gmra.mrb[8].mxu1 %vm198_vm1, %v802_v25 }
 0x561   : > { %v587_v29 = vpop.f32.mrb[8].mxu1 }
 0x562   : > { %v588_v30 = vadd.f32 %v587_v29, %v539_v28  ;;  %v751_v31 = vpop.f32.mrb[9].mxu1 }
 0x563   : > { %v590_v32 = vpop.f32.mrb[10].mxu1 }
 0x564   : > { %v593_v33 = vmax.f32 %v588_v30, 0.0  ;;  %v752_v34 = vpop.f32.mrb[11].mxu1 }
 0x566   : > { %v594_v35 = vmul.f32 %v593_v33, %v593_v33 }
 0x568   : > { %v595_v37 = vadd.f32 %v594_v35, %v458_v36 }
 0x56a   : > { %596 = vst [vmem:[%s160_s29] sm:$0x1] %v595_v37 }
 0x56b   : > { %816 = shalt.err (!%p813_p3)
}
 0x56c   : > { %s817_s11 = scalar_lea.hbm %s1026_s6, 16  ;;  %s821_s20 = scalar_lea.hbm %s1071_s3, 32 }
 0x56d   : > { %p818_p4 = scmp.ne.s32.totalorder %s1026_s6, %s817_s11  ;;  %p822_p9 = scmp.lt.u32.totalorder %s1026_s6, %s1071_s3 }
 0x56e   : > { %p823_p10 = scmp.lt.u32.totalorder %s821_s20, %s817_s11  ;;  %p825_p12 = scmp.lt.u32.totalorder %s817_s11, %s1026_s6 }
 0x56f   : > { %p819_p7 = pnand %p818_p4, %p929_p5 }
 0x570   : > { %p824_p11 = por %p823_p10, %p822_p9 }
 0x571   : > { %p820_p8 = pneg %p819_p7 }
 0x572   : > { %p826_p13 = por %p825_p12, %p824_p11 }
 0x574   : > { %p827_p0 = pnand %p826_p13, %p820_p8 }
 0x576   : > { %830 = shalt.err (!%p827_p0)
}
 0x577   : > { %753 = dma.vmem_to_hbm [thread:$0]  (%p929_p5), %s1028_s30, 16, %s1026_s6, %s598_s7  }
 0x578 PF: > { %p759_p1 = scmp.ge.s32.totalorder %s865_s15, 2  ;;  %s622_s26 = sand.u32 1, %s853_s12  }
 0x579   : > { %s623_s27 = scalar_lea.sflag [#allocation4], %s622_s26 }
 0x57a   : > { %p756_p2 = pnand %p759_p1, %p933_p6 }
 0x57c   : > { %848 = dma.done.wait (!%p756_p2), %s623_s27, 16  }
 0x57d   : > { %850 = vsyncadd (!%p756_p2), %s623_s27, 4294967280  ;;  %p13_p3 = scmp.ge.s32.totalorder %s916_s18, 4   ;;  %s1074_s12 = smov %s857_s13 }
 0x57e   : > { %s1075_s13 = smov %s861_s14  ;;  %s1076_s14 = smov %s927_s21 }
 0x57f   : > { %s1077_s15 = smov %s916_s18  ;;  %15 = sbr.rel (!%p13_p3) target bundleno = 3 (0x3), region = 77 }
 0x586   :  { %627 = vsyncpa [#allocation4], 1 }
 0x587   :  { %629 = vsyncpa [#allocation4 + $0x1], 1 }

</bundles_post_ra>
